<compile_context>
chip_gen: v7x
topology: tpu7x:2x2x1
jax: 0.10.0
libtpu: 0.0.40
codegen_flags: <defaults>
</compile_context>

<pallas_src>
import jax
import jax.numpy as jnp
from jax.experimental import pallas as pl
from jax.experimental.pallas import tpu as pltpu

EPS = 1e-5
LANE = 128
SUBLANE = 8


def _round_up(n, m):
    return (n + m - 1) // m * m


# --------------------------------------------------------------------------
# Kernel: x -> fc1 -> relu -> fc2' -> relu -> fc3' -> relu -> fc4'
# (primes = BN-folded linears)
# --------------------------------------------------------------------------
def mlp_kernel(x_ref,
               w1_ref, b1_ref,
               w2_ref, b2_ref,
               w3_ref, b3_ref,
               w4_ref, b4_ref,
               o_ref):
    x = x_ref[...]

    h = jnp.dot(x, w1_ref[...], preferred_element_type=jnp.float32) + b1_ref[...]
    h = jnp.maximum(h, 0.0)

    h = jnp.dot(h, w2_ref[...], preferred_element_type=jnp.float32) + b2_ref[...]
    h = jnp.maximum(h, 0.0)

    h = jnp.dot(h, w3_ref[...], preferred_element_type=jnp.float32) + b3_ref[...]
    h = jnp.maximum(h, 0.0)

    o_ref[...] = jnp.dot(h, w4_ref[...], preferred_element_type=jnp.float32) + b4_ref[...]


# --------------------------------------------------------------------------
# Parameter prep: fold eval-mode BN into the following linear; lane-pad fc4.
# --------------------------------------------------------------------------
def _fold_bn_into_next_linear(gamma, beta, mean, var, w_next, b_next):
    s = gamma * jax.lax.rsqrt(var + EPS)          # (1, N)
    t = beta - mean * s                           # (1, N)
    w_folded = s.reshape(-1, 1) * w_next          # diag(s) @ W   -> (N, M)
    b_folded = t @ w_next + b_next                # (1, M)
    return w_folded, b_folded


def prepare_folded_params(p, out_pad):
    # bn1 feeds fc2, bn2 feeds fc3, bn1 (reused) feeds fc4 — as in the module.
    w2f, b2f = _fold_bn_into_next_linear(p["g1"], p["be1"], p["m1"], p["v1"],
                                         p["w2"], p["b2"])
    w3f, b3f = _fold_bn_into_next_linear(p["g2"], p["be2"], p["m2"], p["v2"],
                                         p["w3"], p["b3"])
    w4f, b4f = _fold_bn_into_next_linear(p["g1"], p["be1"], p["m1"], p["v1"],
                                         p["w4"], p["b4"])
    # Lane-densify the output: zero-pad fc4 columns to a multiple of 128.
    out_size = w4f.shape[1]
    pad = out_pad - out_size
    if pad > 0:
        w4f = jnp.pad(w4f, ((0, 0), (0, pad)))
        b4f = jnp.pad(b4f, ((0, 0), (0, pad)))
    return (p["w1"], p["b1"], w2f, b2f, w3f, b3f, w4f, b4f)


# --------------------------------------------------------------------------
# Wrapper
# --------------------------------------------------------------------------
def embeddings_nn_forward(x, params):
    """x: [B, input_size] float32. params: dict of weights (see init_params)."""
    B, in_size = x.shape
    out_size = params["w4"].shape[1]
    out_pad = _round_up(max(out_size, LANE), LANE)

    folded = prepare_folded_params(params, out_pad)

    # Batch tiling: pipeline activation DMA against MXU compute for large B,
    # degenerate to a single step at demo sizes. Rows padded to sublane/tile.
    tile_b = 128 if B >= 128 else _round_up(B, SUBLANE)
    b_pad = _round_up(B, tile_b)
    if b_pad != B:
        x = jnp.pad(x, ((0, b_pad - B), (0, 0)))

    # Weights/biases: full-array blocks, same block index every grid step
    # -> kept resident in VMEM across the batch loop.
    resident_specs = [pl.BlockSpec(a.shape, lambda i: (0, 0)) for a in folded]

    out = pl.pallas_call(
        mlp_kernel,
        out_shape=jax.ShapeDtypeStruct((b_pad, out_pad), jnp.float32),
        grid=(b_pad // tile_b,),
        in_specs=[pl.BlockSpec((tile_b, in_size), lambda i: (i, 0))]
                 + resident_specs,
        out_specs=pl.BlockSpec((tile_b, out_pad), lambda i: (i, 0)),
        compiler_params=pltpu.CompilerParams(
            dimension_semantics=("parallel",),       # 2-TC sharding on v7x
            vmem_limit_bytes=32 * 1024 * 1024,       # fits v5e/v6e/v7x scoped VMEM
        ),
    )(x, *folded)

    return out[:B, :out_size]


# --------------------------------------------------------------------------
# Synthetic params (shapes match the PyTorch module) and pure-JAX reference.
# --------------------------------------------------------------------------
def init_params(key, input_size, hidden_size, output_size):
    ks = jax.random.split(key, 12)

    def linear(kw, kb, fan_in, fan_out):
        bound = 1.0 / jnp.sqrt(fan_in)
        # stored as [in, out] (pre-transposed vs. PyTorch's [out, in])
        w = jax.random.uniform(kw, (fan_in, fan_out), jnp.float32, -bound, bound)
        b = jax.random.uniform(kb, (1, fan_out), jnp.float32, -bound, bound)
        return w, b

    w1, b1 = linear(ks[0], ks[1], input_size, hidden_size)
    w2, b2 = linear(ks[2], ks[3], hidden_size, 2 * hidden_size)
    w3, b3 = linear(ks[4], ks[5], 2 * hidden_size, hidden_size)
    w4, b4 = linear(ks[6], ks[7], hidden_size, output_size)

    # BatchNorm1d running stats / affine (eval mode). Non-trivial values so the
    # BN fold is actually exercised.
    g1 = 1.0 + 0.1 * jax.random.normal(ks[8], (1, hidden_size), jnp.float32)
    be1 = 0.1 * jax.random.normal(ks[9], (1, hidden_size), jnp.float32)
    m1 = 0.05 * jax.random.normal(ks[10], (1, hidden_size), jnp.float32)
    v1 = 1.0 + 0.1 * jnp.abs(jax.random.normal(ks[11], (1, hidden_size), jnp.float32))

    g2 = jnp.ones((1, 2 * hidden_size), jnp.float32)
    be2 = jnp.zeros((1, 2 * hidden_size), jnp.float32)
    m2 = jnp.zeros((1, 2 * hidden_size), jnp.float32)
    v2 = jnp.ones((1, 2 * hidden_size), jnp.float32)

    return dict(w1=w1, b1=b1, g1=g1, be1=be1, m1=m1, v1=v1,
                w2=w2, b2=b2, g2=g2, be2=be2, m2=m2, v2=v2,
                w3=w3, b3=b3, w4=w4, b4=b4)


def reference_forward(x, p):
    """Pure-JAX reference of the same eval-mode forward (un-folded BN)."""
    def bn(h, g, be, m, v):
        return (h - m) * jax.lax.rsqrt(v + EPS) * g + be

    h = jnp.maximum(x @ p["w1"] + p["b1"], 0.0)
    h = bn(h, p["g1"], p["be1"], p["m1"], p["v1"])
    h = jnp.maximum(h @ p["w2"] + p["b2"], 0.0)
    h = bn(h, p["g2"], p["be2"], p["m2"], p["v2"])
    h = jnp.maximum(h @ p["w3"] + p["b3"], 0.0)
    h = bn(h, p["g1"], p["be1"], p["m1"], p["v1"])
    return h @ p["w4"] + p["b4"]


if __name__ == "__main__":
    # Small shapes consistent with the module: batch=8, input_size=32,
    # hidden_size=64, output_size=9 (len(gems9)).
    B, INPUT_SIZE, HIDDEN, OUTPUT = 8, 32, 64, 9

    key = jax.random.PRNGKey(0)
    kx, kp = jax.random.split(key)
    x = jax.random.normal(kx, (B, INPUT_SIZE), jnp.float32)
    params = init_params(kp, INPUT_SIZE, HIDDEN, OUTPUT)

    out = embeddings_nn_forward(x, params)
    out = jax.block_until_ready(out)

    ref = reference_forward(x, params)
    assert out.shape == (B, OUTPUT), out.shape
    assert jnp.allclose(out, ref, atol=1e-4, rtol=1e-4), "mismatch vs reference"

    # TODO(synk): training-mode BatchNorm (batch statistics + stat updates) and
    # Dropout1d masking are not implemented; this kernel reproduces the
    # eval-mode forward exactly.
    print("KERNEL_OK")
</pallas_src>

<mosaic_0001>
module attributes {stable_mosaic.version = 11 : i64} {
  func.func @mlp_kernel(%arg0: i32, %arg1: memref<8x32xf32, #tpu.memory_space<vmem>>, %arg2: memref<32x64xf32, #tpu.memory_space<vmem>>, %arg3: memref<1x64xf32, #tpu.memory_space<vmem>>, %arg4: memref<64x128xf32, #tpu.memory_space<vmem>>, %arg5: memref<1x128xf32, #tpu.memory_space<vmem>>, %arg6: memref<128x64xf32, #tpu.memory_space<vmem>>, %arg7: memref<1x64xf32, #tpu.memory_space<vmem>>, %arg8: memref<64x128xf32, #tpu.memory_space<vmem>>, %arg9: memref<1x128xf32, #tpu.memory_space<vmem>>, %arg10: memref<8x128xf32, #tpu.memory_space<vmem>>) attributes {dimension_semantics = [#tpu.dimension_semantics<parallel>], iteration_bounds = array<i64: 1>, scalar_prefetch = 0 : i64, scratch_operands = 0 : i64, tpu.core_type = #tpu.core_type<tc>, window_params = [{transform_indices = @transform_0, window_bounds = array<i64: 8, 32>}, {pipeline_mode = #tpu.pipeline_mode<synchronous>, transform_indices = @transform_1, window_bounds = array<i64: 32, 64>}, {pipeline_mode = #tpu.pipeline_mode<synchronous>, transform_indices = @transform_2, window_bounds = array<i64: 1, 64>}, {pipeline_mode = #tpu.pipeline_mode<synchronous>, transform_indices = @transform_3, window_bounds = array<i64: 64, 128>}, {pipeline_mode = #tpu.pipeline_mode<synchronous>, transform_indices = @transform_4, window_bounds = array<i64: 1, 128>}, {pipeline_mode = #tpu.pipeline_mode<synchronous>, transform_indices = @transform_5, window_bounds = array<i64: 128, 64>}, {pipeline_mode = #tpu.pipeline_mode<synchronous>, transform_indices = @transform_6, window_bounds = array<i64: 1, 64>}, {pipeline_mode = #tpu.pipeline_mode<synchronous>, transform_indices = @transform_7, window_bounds = array<i64: 64, 128>}, {pipeline_mode = #tpu.pipeline_mode<synchronous>, transform_indices = @transform_8, window_bounds = array<i64: 1, 128>}, {transform_indices = @transform_9, window_bounds = array<i64: 8, 128>}]} {
    %c0 = arith.constant 0 : index
    %c0_0 = arith.constant 0 : index
    %0 = vector.load %arg1[%c0, %c0_0] : memref<8x32xf32, #tpu.memory_space<vmem>>, vector<8x32xf32>
    %c0_1 = arith.constant 0 : index
    %c0_2 = arith.constant 0 : index
    %1 = vector.load %arg2[%c0_1, %c0_2] : memref<32x64xf32, #tpu.memory_space<vmem>>, vector<32x64xf32>
    %cst = arith.constant dense<0.000000e+00> : vector<8x64xf32>
    %2 = tpu.matmul %0, %1, %cst {dimension_numbers = #tpu.dot_dimension_numbers<[1], [0], [0], [1], [0, 0, 1, 1], [], []>} : vector<8x32xf32>, vector<32x64xf32>, vector<8x64xf32> -> vector<8x64xf32>
    %c0_3 = arith.constant 0 : index
    %c0_4 = arith.constant 0 : index
    %3 = vector.load %arg3[%c0_3, %c0_4] : memref<1x64xf32, #tpu.memory_space<vmem>>, vector<1x64xf32>
    %4 = vector.broadcast %3 : vector<1x64xf32> to vector<8x64xf32>
    %5 = arith.addf %2, %4 : vector<8x64xf32>
    %cst_5 = arith.constant 0.000000e+00 : f32
    %6 = vector.broadcast %cst_5 : f32 to vector<8x64xf32>
    %7 = arith.maximumf %5, %6 : vector<8x64xf32>
    %c0_6 = arith.constant 0 : index
    %c0_7 = arith.constant 0 : index
    %8 = vector.load %arg4[%c0_6, %c0_7] : memref<64x128xf32, #tpu.memory_space<vmem>>, vector<64x128xf32>
    %cst_8 = arith.constant dense<0.000000e+00> : vector<8x128xf32>
    %9 = tpu.matmul %7, %8, %cst_8 {dimension_numbers = #tpu.dot_dimension_numbers<[1], [0], [0], [1], [0, 0, 1, 1], [], []>} : vector<8x64xf32>, vector<64x128xf32>, vector<8x128xf32> -> vector<8x128xf32>
    %c0_9 = arith.constant 0 : index
    %c0_10 = arith.constant 0 : index
    %10 = vector.load %arg5[%c0_9, %c0_10] : memref<1x128xf32, #tpu.memory_space<vmem>>, vector<1x128xf32>
    %11 = vector.broadcast %10 : vector<1x128xf32> to vector<8x128xf32>
    %12 = arith.addf %9, %11 : vector<8x128xf32>
    %cst_11 = arith.constant 0.000000e+00 : f32
    %13 = vector.broadcast %cst_11 : f32 to vector<8x128xf32>
    %14 = arith.maximumf %12, %13 : vector<8x128xf32>
    %c0_12 = arith.constant 0 : index
    %c0_13 = arith.constant 0 : index
    %15 = vector.load %arg6[%c0_12, %c0_13] : memref<128x64xf32, #tpu.memory_space<vmem>>, vector<128x64xf32>
    %cst_14 = arith.constant dense<0.000000e+00> : vector<8x64xf32>
    %16 = tpu.matmul %14, %15, %cst_14 {dimension_numbers = #tpu.dot_dimension_numbers<[1], [0], [0], [1], [0, 0, 1, 1], [], []>} : vector<8x128xf32>, vector<128x64xf32>, vector<8x64xf32> -> vector<8x64xf32>
    %c0_15 = arith.constant 0 : index
    %c0_16 = arith.constant 0 : index
    %17 = vector.load %arg7[%c0_15, %c0_16] : memref<1x64xf32, #tpu.memory_space<vmem>>, vector<1x64xf32>
    %18 = vector.broadcast %17 : vector<1x64xf32> to vector<8x64xf32>
    %19 = arith.addf %16, %18 : vector<8x64xf32>
    %cst_17 = arith.constant 0.000000e+00 : f32
    %20 = vector.broadcast %cst_17 : f32 to vector<8x64xf32>
    %21 = arith.maximumf %19, %20 : vector<8x64xf32>
    %c0_18 = arith.constant 0 : index
    %c0_19 = arith.constant 0 : index
    %22 = vector.load %arg8[%c0_18, %c0_19] : memref<64x128xf32, #tpu.memory_space<vmem>>, vector<64x128xf32>
    %cst_20 = arith.constant dense<0.000000e+00> : vector<8x128xf32>
    %23 = tpu.matmul %21, %22, %cst_20 {dimension_numbers = #tpu.dot_dimension_numbers<[1], [0], [0], [1], [0, 0, 1, 1], [], []>} : vector<8x64xf32>, vector<64x128xf32>, vector<8x128xf32> -> vector<8x128xf32>
    %c0_21 = arith.constant 0 : index
    %c0_22 = arith.constant 0 : index
    %24 = vector.load %arg9[%c0_21, %c0_22] : memref<1x128xf32, #tpu.memory_space<vmem>>, vector<1x128xf32>
    %25 = vector.broadcast %24 : vector<1x128xf32> to vector<8x128xf32>
    %26 = arith.addf %23, %25 : vector<8x128xf32>
    %c0_23 = arith.constant 0 : index
    %c0_24 = arith.constant 0 : index
    %27 = vector.load %arg10[%c0_23, %c0_24] : memref<8x128xf32, #tpu.memory_space<vmem>>, vector<8x128xf32>
    tpu.vector_store %arg10[%c0_23, %c0_24], %26 {strides = array<i32>} : memref<8x128xf32, #tpu.memory_space<vmem>>, vector<8x128xf32>,
    return
  }
  func.func @transform_0(%arg0: i32) -> (i32, i32) {
    %c0_i32 = arith.constant 0 : i32
    %c0_i32_0 = arith.constant 0 : i32
    return %arg0, %c0_i32 : i32, i32
  }
  func.func @transform_1(%arg0: i32) -> (i32, i32) {
    %c0_i32 = arith.constant 0 : i32
    %c0_i32_0 = arith.constant 0 : i32
    %c0_i32_1 = arith.constant 0 : i32
    return %c0_i32, %c0_i32_0 : i32, i32
  }
  func.func @transform_2(%arg0: i32) -> (i32, i32) {
    %c0_i32 = arith.constant 0 : i32
    %c0_i32_0 = arith.constant 0 : i32
    %c0_i32_1 = arith.constant 0 : i32
    return %c0_i32, %c0_i32_0 : i32, i32
  }
  func.func @transform_3(%arg0: i32) -> (i32, i32) {
    %c0_i32 = arith.constant 0 : i32
    %c0_i32_0 = arith.constant 0 : i32
    %c0_i32_1 = arith.constant 0 : i32
    return %c0_i32, %c0_i32_0 : i32, i32
  }
  func.func @transform_4(%arg0: i32) -> (i32, i32) {
    %c0_i32 = arith.constant 0 : i32
    %c0_i32_0 = arith.constant 0 : i32
    %c0_i32_1 = arith.constant 0 : i32
    return %c0_i32, %c0_i32_0 : i32, i32
  }
  func.func @transform_5(%arg0: i32) -> (i32, i32) {
    %c0_i32 = arith.constant 0 : i32
    %c0_i32_0 = arith.constant 0 : i32
    %c0_i32_1 = arith.constant 0 : i32
    return %c0_i32, %c0_i32_0 : i32, i32
  }
  func.func @transform_6(%arg0: i32) -> (i32, i32) {
    %c0_i32 = arith.constant 0 : i32
    %c0_i32_0 = arith.constant 0 : i32
    %c0_i32_1 = arith.constant 0 : i32
    return %c0_i32, %c0_i32_0 : i32, i32
  }
  func.func @transform_7(%arg0: i32) -> (i32, i32) {
    %c0_i32 = arith.constant 0 : i32
    %c0_i32_0 = arith.constant 0 : i32
    %c0_i32_1 = arith.constant 0 : i32
    return %c0_i32, %c0_i32_0 : i32, i32
  }
  func.func @transform_8(%arg0: i32) -> (i32, i32) {
    %c0_i32 = arith.constant 0 : i32
    %c0_i32_0 = arith.constant 0 : i32
    %c0_i32_1 = arith.constant 0 : i32
    return %c0_i32, %c0_i32_0 : i32, i32
  }
  func.func @transform_9(%arg0: i32) -> (i32, i32) {
    %c0_i32 = arith.constant 0 : i32
    %c0_i32_0 = arith.constant 0 : i32
    return %arg0, %c0_i32 : i32, i32
  }
}

</mosaic_0001>

<bundles_post_ra>
// kernel: tpu_custom_call.1
= control target key start
LH: loop header
LB: loop body
LE: loop exit
PB: predicated region body
PF: predicated region fallthrough
CT: control target
= control target key end

     0   :  { %v620_v3 = vmov 0.0|0.0   ;;  %vm621_vm0 = vmmov 0   ;;  %v622_v6 = vmov 0.0   ;;  %s837_s0 = inlined_call_operand.vmem [shape: f32[8,32], index: 0, kind: input, shape index: {}]   ;;  %s838_s1 = inlined_call_operand.vmem [shape: f32[32,64], index: 1, kind: input, shape index: {}]   ;;  %s839_s2 = inlined_call_operand.vmem [shape: f32[1,64], index: 2, kind: input, shape index: {}]   ;;  %s840_s3 = inlined_call_operand.vmem [shape: f32[64,128], index: 3, kind: input, shape index: {}]   ;;  %s841_s4 = inlined_call_operand.vmem [shape: f32[1,128], index: 4, kind: input, shape index: {}]   ;;  %s842_s5 = inlined_call_operand.vmem [shape: f32[128,64], index: 5, kind: input, shape index: {}]   ;;  %s843_s6 = inlined_call_operand.vmem [shape: f32[1,64], index: 6, kind: input, shape index: {}]   ;;  %s844_s7 = inlined_call_operand.vmem [shape: f32[64,128], index: 7, kind: input, shape index: {}]   ;;  %s845_s8 = inlined_call_operand.vmem [shape: f32[1,128], index: 8, kind: input, shape index: {}]   ;;  %s846_s9 = inlined_call_operand.hbm [shape: f32[8,128], index: 9, kind: output, shape index: {}]  }
   0x1   :  { %v34_v0 = vld [vmem:[%s838_s1] sm:$0xff]  ;;  %v35_v1 = vld [vmem:[%s838_s1 + $0x8] sm:$0xff]  ;;  %v36_v2 = vld [vmem:[%s838_s1 + $0x10] sm:$0xff]  ;;  %538 = vmatprep.subr.bf16.mxu0 %v620_v3  ;;  %462 = vmatprep.mubr.msk.f32.mxu0 %vm621_vm0, %v622_v6 }
   0x2   :  { %v539_v4 = vpack.c.bf16 %v35_v1, %v34_v0  ;;  %v37_v5 = vld [vmem:[%s838_s1 + $0x18] sm:$0xff]  ;;  %v120_v7 = vld [vmem:[%s840_s3] sm:$0xff]  ;;  %544 = vmatprep.subr.bf16.mxu1 %v620_v3  ;;  %v121_v8 = vld [vmem:[%s840_s3 + $0x8] sm:$0xff]  ;;  %481 = vmatprep.mubr.msk.f32.mxu1 %vm621_vm0, %v622_v6 }
   0x3   :  { %v122_v9 = vld [vmem:[%s840_s3 + $0x10] sm:$0xff]  ;;  %v123_v10 = vld [vmem:[%s840_s3 + $0x18] sm:$0xff]  ;;  %v542_v11 = vpack.c.bf16 %v37_v5, %v36_v2  ;;  %v545_v12 = vpack.c.bf16 %v121_v8, %v120_v7 }
   0x4   :  { %540 = vmatpush3.bf16.msra.mxu0 %v539_v4 }
   0x5   :  { %541 = vmatprep.subr.bf16.mxu0 %v620_v3 }
   0x6   :  { %14 = vsyncpa [#allocation3], 0  ;;  %546 = vmatpush3.bf16.msra.mxu1 %v545_v12  ;;  %v548_v13 = vpack.c.bf16 %v123_v10, %v122_v9  ;;  %v124_v14 = vld [vmem:[%s840_s3 + $0x20] sm:$0xff]  ;;  %v125_v15 = vld [vmem:[%s840_s3 + $0x28] sm:$0xff]  ;;  %vm45_vm1 = vcmask 261120   ;;  %vm135_vm2 = vcmask 523264  }
   0x7   :  { %547 = vmatprep.subr.bf16.mxu1 %v620_v3  ;;  %v33_v16 = vld [vmem:[%s837_s0] sm:$0xff]  ;;  %v551_v17 = vpack.c.bf16 %v125_v15, %v124_v14  ;;  %v126_v18 = vld [vmem:[%s840_s3 + $0x30] sm:$0xff]  ;;  %v127_v19 = vld [vmem:[%s840_s3 + $0x38] sm:$0xff]  ;;  %s623_s17 = smov [#allocation2]  }
   0x8   :  { %543 = vmatpush3.bf16.msra.mxu0 %v542_v11  ;;  %v554_v20 = vpack.c.bf16 %v127_v19, %v126_v18  ;;  %v210_v21 = vld [vmem:[%s842_s5] sm:$0xff]  ;;  %v211_v22 = vld [vmem:[%s842_s5 + $0x8] sm:$0xff]  ;;  %v212_v23 = vld [vmem:[%s842_s5 + $0x10] sm:$0xff]  ;;  %s399_s18 = sshll.u32 %s623_s17, 4  ;;  %s400_s18 = int_to_ptr.vmem [resolvable:$true] %s399_s18 }
   0x9   :  { %556 = vmatprep.subr.bf16.mxu0 %v620_v3  ;;  %v557_v24 = vpack.c.bf16 %v211_v22, %v210_v21  ;;  %v213_v25 = vld [vmem:[%s842_s5 + $0x18] sm:$0xff]  ;;  %v214_v27 = vld [vmem:[%s842_s5 + $0x20] sm:$0xff]  ;;  %v215_v28 = vld [vmem:[%s842_s5 + $0x28] sm:$0xff]  ;;  %p601_p1 = scmp.lt.s32.totalorder %s400_s18, %s400_s18 }
   0xa   :  { %549 = vmatpush3.bf16.msra.mxu1 %v548_v13  ;;  %v560_v26 = vpack.c.bf16 %v213_v25, %v212_v23  ;;  %v563_v29 = vpack.c.bf16 %v215_v28, %v214_v27  ;;  %v216_v30 = vld [vmem:[%s842_s5 + $0x30] sm:$0xff]  ;;  %v217_v31 = vld [vmem:[%s842_s5 + $0x38] sm:$0xff]  ;;  %v218_v33 = vld [vmem:[%s842_s5 + $0x40] sm:$0xff] }
   0xb   :  { %463 = vmatmul.mubr.msk.f32.vlgmr.msra.gmra.mrb[0].mxu0 %vm45_vm1, %v33_v16  ;;  %550 = vmatprep.subr.bf16.mxu1 %v620_v3  ;;  %v566_v32 = vpack.c.bf16 %v217_v31, %v216_v30  ;;  %v219_v34 = vld [vmem:[%s842_s5 + $0x48] sm:$0xff]  ;;  %v220_v36 = vld [vmem:[%s842_s5 + $0x50] sm:$0xff]  ;;  %v221_v37 = vld [vmem:[%s842_s5 + $0x58] sm:$0xff] }
   0xc   :  { %516 = vmatprep.mubr.msk.f32.mxu0 %vm621_vm0, %v622_v6  ;;  %558 = vmatpush3.bf16.msra.mxu0 %v557_v24  ;;  %v569_v35 = vpack.c.bf16 %v219_v34, %v218_v33  ;;  %v572_v38 = vpack.c.bf16 %v221_v37, %v220_v36  ;;  %v222_v39 = vld [vmem:[%s842_s5 + $0x60] sm:$0xff]  ;;  %v223_v40 = vld [vmem:[%s842_s5 + $0x68] sm:$0xff]  ;;  %v224_v47 = vld [vmem:[%s842_s5 + $0x70] sm:$0xff] }
   0xd   :  { %559 = vmatprep.subr.bf16.mxu0 %v620_v3  ;;  %v575_v41 = vpack.c.bf16 %v223_v40, %v222_v39  ;;  %v407_v42 = vld [vmem:[%s839_s2] ss:$0 sm:$0xff]  ;;  %v225_v48 = vld [vmem:[%s842_s5 + $0x78] sm:$0xff]  ;;  %v305_v51 = vld [vmem:[%s844_s7 + $0x8] sm:$0xff] }
   0xe   :  { %552 = vmatpush3.bf16.msra.mxu1 %v551_v17  ;;  %v578_v49 = vpack.c.bf16 %v225_v48, %v224_v47  ;;  %v304_v50 = vld [vmem:[%s844_s7] sm:$0xff]  ;;  %v306_v52 = vld [vmem:[%s844_s7 + $0x10] sm:$0xff]  ;;  %v307_v54 = vld [vmem:[%s844_s7 + $0x18] sm:$0xff] }
   0xf   :  { %553 = vmatprep.subr.bf16.mxu1 %v620_v3  ;;  %v581_v53 = vpack.c.bf16 %v305_v51, %v304_v50  ;;  %v584_v55 = vpack.c.bf16 %v307_v54, %v306_v52  ;;  %v308_v56 = vld [vmem:[%s844_s7 + $0x20] sm:$0xff]  ;;  %v309_v57 = vld [vmem:[%s844_s7 + $0x28] sm:$0xff]  ;;  %v310_v0 = vld [vmem:[%s844_s7 + $0x30] sm:$0xff] }
  0x10   :  { %561 = vmatpush3.bf16.msra.mxu0 %v560_v26  ;;  %v587_v58 = vpack.c.bf16 %v309_v57, %v308_v56  ;;  %v409_v59 = vld [vmem:[%s841_s4] ss:$0 sm:$0xff]  ;;  %v311_v1 = vld [vmem:[%s844_s7 + $0x38] sm:$0xff]  ;;  %s596_s7 = scalar_lea.vmem %s400_s18, 128 }
  0x11   :  { %562 = vmatprep.subr.bf16.mxu0 %v620_v3  ;;  %v590_v2 = vpack.c.bf16 %v311_v1, %v310_v0  ;;  %v412_v8 = vld [vmem:[%s845_s8] ss:$0 sm:$0xff]  ;;  %p597_p0 = scmp.ne.s32.totalorder %s400_s18, %s596_s7  ;;  %p602_p2 = scmp.lt.s32.totalorder %s596_s7, %s596_s7 }
  0x12   :  { %555 = vmatpush3.bf16.msra.mxu1 %v554_v20 }
  0x13   :  { %580 = vmatprep.subr.bf16.mxu1 %v620_v3  ;;  %p603_p3 = por %p602_p2, %p601_p1 }
  0x14   :  { %564 = vmatpush3.bf16.msra.mxu0 %v563_v29 }
  0x15   :  { %565 = vmatprep.subr.bf16.mxu0 %v620_v3  ;;  %p604_p4 = pnand %p603_p3, %p597_p0 }
  0x18   :  { %567 = vmatpush3.bf16.msra.mxu0 %v566_v32 }
  0x19   :  { %568 = vmatprep.subr.bf16.mxu0 %v620_v3 }
  0x1c   :  { %570 = vmatpush3.bf16.msra.mxu0 %v569_v35 }
  0x1d   :  { %571 = vmatprep.subr.bf16.mxu0 %v620_v3 }
  0x20   :  { %573 = vmatpush3.bf16.msra.mxu0 %v572_v38 }
  0x21   :  { %574 = vmatprep.subr.bf16.mxu0 %v620_v3 }
  0x24   :  { %576 = vmatpush3.bf16.msra.mxu0 %v575_v41 }
  0x25   :  { %577 = vmatprep.subr.bf16.mxu0 %v620_v3 }
  0x28   :  { %579 = vmatpush3.bf16.msra.mxu0 %v578_v49 }
  0xde   :  { %v115_v43 = vpop.f32.mrb[0].mxu0 }
  0xdf   :  { %v116_v44 = vadd.f32 %v407_v42, %v115_v43  ;;  %v464_v45 = vpop.f32.mrb[1].mxu0 }
  0xe1   :  { %v119_v46 = vmax.f32 %v116_v44, 0.0 }
  0xe3   :  { %482 = vmatmul.mubr.msk.f32.vlgmr.msra.gmra.mrb[0].mxu1 %vm135_vm2, %v119_v46 }
  0xe4   :  { %535 = vmatprep.mubr.msk.f32.mxu1 %vm621_vm0, %v622_v6  ;;  %582 = vmatpush3.bf16.msra.mxu1 %v581_v53 }
  0xe5   :  { %583 = vmatprep.subr.bf16.mxu1 %v620_v3 }
  0xe8   :  { %585 = vmatpush3.bf16.msra.mxu1 %v584_v55 }
  0xe9   :  { %586 = vmatprep.subr.bf16.mxu1 %v620_v3 }
  0xec   :  { %588 = vmatpush3.bf16.msra.mxu1 %v587_v58 }
  0xed   :  { %589 = vmatprep.subr.bf16.mxu1 %v620_v3  ;;  %v411_v3 = vld [vmem:[%s843_s6] ss:$0 sm:$0xff] }
  0xf0   :  { %591 = vmatpush3.bf16.msra.mxu1 %v590_v2 }
 0x1b6   :  { %v205_v60 = vpop.f32.mrb[0].mxu1 }
 0x1b7   :  { %v206_v61 = vadd.f32 %v409_v59, %v205_v60  ;;  %v483_v62 = vpop.f32.mrb[1].mxu1 }
 0x1b9   :  { %v209_v63 = vmax.f32 %v206_v61, 0.0 }
 0x1bb   :  { %517 = vmatmul.mubr.f32.vlgmr.msra.gmra.mrb[2].mxu0 %v209_v63 }
 0x28e   :  { %v299_v4 = vpop.f32.mrb[2].mxu0 }
 0x28f   :  { %v300_v5 = vadd.f32 %v411_v3, %v299_v4  ;;  %v518_v6 = vpop.f32.mrb[3].mxu0 }
 0x291   :  { %v303_v7 = vmax.f32 %v300_v5, 0.0 }
 0x293   :  { %536 = vmatmul.mubr.msk.f32.vlgmr.msra.gmra.mrb[2].mxu1 %vm135_vm2, %v303_v7 }
 0x366   :  { %v388_v9 = vpop.f32.mrb[2].mxu1 }
 0x367   :  { %v389_v10 = vadd.f32 %v412_v8, %v388_v9  ;;  %v537_v11 = vpop.f32.mrb[3].mxu1 }
 0x369   :  { %392 = vst [vmem:[#allocation2] sm:$0xff] %v389_v10 }
 0x36a   :  { %607 = shalt.err (!%p604_p4)
}
 0x36b   :  { %s608_s3 = scalar_lea.hbm %s846_s9, 128 }
 0x36c   :  { %p609_p5 = scmp.ne.s32.totalorder %s846_s9, %s608_s3  ;;  %p612_p6 = scmp.lt.u32.totalorder %s608_s3, %s846_s9 }
 0x36e   :  { %p614_p7 = pnand %p612_p6, %p609_p5 }
 0x370   :  { %617 = shalt.err (!%p614_p7)
}
 0x371   :  { %402 = dma.vmem_to_hbm [thread:$0]  %s400_s18, 128, %s846_s9, [#allocation3]  }
 0x372   :  { %618 = dma.done.wait [#allocation3], 128  }
 0x373   :  { %619 = vsyncadd [#allocation3], 4294967168 }
 0x374   :  { %406 = vsyncpa [#allocation3], 1 }

</bundles_post_ra>
